<compile_context>
chip_gen: v5e
topology: v5e:2x2
jax: 0.10.0
libtpu: 0.0.40
codegen_flags: <defaults>
</compile_context>

<pallas_src>
import jax
import jax.numpy as jnp
from jax.experimental import pallas as pl
from jax.experimental.pallas import tpu as pltpu


# Flat SMEM parameter layout: per layer, W stored row-major (index k*N + n),
# followed by the N bias scalars.
_L0_OFF = 0    # 3*5 + 5 = 20 entries
_L1_OFF = 20   # 5*4 + 4 = 24 entries  (folded layer1 chain)
_L2_OFF = 44   # 4*2 + 2 = 10 entries
_L3_OFF = 54   # 2*2 + 2 = 6 entries
_N_PARAMS = 60


def mlp_kernel(p_ref, x_ref, o_ref):
    """Batch-on-lanes MLP forward.

    p_ref: (60,) f32 in SMEM (flat weights + biases, scalar-indexed)
    x_ref: (3, TB) f32 in VMEM  (features on sublanes, batch on lanes)
    o_ref: (2, TB) f32 in VMEM
    """
    # Keep activations as lists of lane-dense (1, TB) rows; all MACs are
    # scalar (SMEM) x vector (VPU) with no cross-lane broadcasts.
    z = [x_ref[k:k + 1, :] for k in range(3)]

    def linear_relu(z_rows, off, k_in, n_out):
        out_rows = []
        for n in range(n_out):
            acc = p_ref[off + n] * z_rows[0]
            for k in range(1, k_in):
                acc = acc + p_ref[off + k * n_out + n] * z_rows[k]
            acc = acc + p_ref[off + k_in * n_out + n]  # bias (scalar splat)
            out_rows.append(jnp.maximum(acc, 0.0))
        return out_rows

    z = linear_relu(z, _L0_OFF, 3, 5)   # layer0: 3 -> 5, ReLU
    z = linear_relu(z, _L1_OFF, 5, 4)   # folded layer1: 5 -> 4, ReLU
    z = linear_relu(z, _L2_OFF, 4, 2)   # layer2: 4 -> 2, ReLU
    z = linear_relu(z, _L3_OFF, 2, 2)   # layer3: 2 -> 2, ReLU

    o_ref[...] = jnp.concatenate(z, axis=0).astype(o_ref.dtype)


def _round_up(n, m):
    return ((n + m - 1) // m) * m


def mlp_forward(x, params_flat, *, batch_tile=512):
    """x: (B, 3) f32, params_flat: (60,) f32 flat parameter vector."""
    B = x.shape[0]
    # Lane (last) dim of every block must be a multiple of 128.
    tb = max(128, (min(batch_tile, _round_up(B, 128)) // 128) * 128)
    b_pad = _round_up(B, tb)
    n_blocks = b_pad // tb

    # Transpose to (features, batch): lane-dense loads/stores, contiguous
    # HBM DMA rows.  Pad the batch (lane) axis; padded columns are sliced off.
    xt = jnp.zeros((3, b_pad), jnp.float32).at[:, :B].set(x.T)

    cost = pl.CostEstimate(
        flops=2 * b_pad * (3 * 5 + 5 * 4 + 4 * 2 + 2 * 2),
        transcendentals=0,
        bytes_accessed=4 * (b_pad * 3 + b_pad * 2 + _N_PARAMS),
    )

    out_t = pl.pallas_call(
        mlp_kernel,
        out_shape=jax.ShapeDtypeStruct((2, b_pad), jnp.float32),
        grid=(n_blocks,),
        in_specs=[
            pl.BlockSpec(memory_space=pltpu.MemorySpace.SMEM),  # params
            pl.BlockSpec((3, tb), lambda i: (0, i)),            # x, lane-dense
        ],
        out_specs=pl.BlockSpec((2, tb), lambda i: (0, i)),
        compiler_params=pltpu.CompilerParams(
            dimension_semantics=("parallel",)),
        cost_estimate=cost,
    )(params_flat, xt)

    return out_t[:, :B].T


def init_params(key):
    """Deterministic init mirroring nn.Linear (weight: (out,in), bias: (out,)).

    Returns a list of (W_t, b) with W_t transposed to (in, out)."""
    dims = [(3, 5), (5, 4), (4, 4), (4, 4), (4, 2), (2, 2)]
    params = []
    for (fan_in, fan_out) in dims:
        key, kw, kb = jax.random.split(key, 3)
        bound = 1.0 / jnp.sqrt(jnp.float32(fan_in))
        w = jax.random.uniform(kw, (fan_out, fan_in), jnp.float32, -bound, bound)
        b = jax.random.uniform(kb, (fan_out,), jnp.float32, -bound, bound)
        params.append((w.T, b))
    return params


def pack_params(params):
    """Fold the layer1 chain and pack all weights/biases into one flat f32[60]."""
    (w0, b0), (w1a, b1a), (w1b, b1b), (w1c, b1c), (w2, b2), (w3, b3) = params

    # Exact algebraic fold of the three back-to-back linears (no activation
    # between them): y = x@(Wa@Wb@Wc) + (ba@Wb@Wc + bb@Wc + bc)
    w1 = w1a @ w1b @ w1c                     # (5, 4)
    b1 = b1a @ w1b @ w1c + b1b @ w1c + b1c   # (4,)

    parts = []
    for w, b in [(w0, b0), (w1, b1), (w2, b2), (w3, b3)]:
        parts.append(w.reshape(-1))   # row-major: index k*N + n
        parts.append(b.reshape(-1))
    flat = jnp.concatenate(parts).astype(jnp.float32)
    assert flat.shape == (_N_PARAMS,), flat.shape
    return flat


def reference_forward(x, params):
    """Unfused pure-JAX reference matching the original PyTorch module."""
    relu_after = [True, False, False, True, True, True]
    z = x
    for (w_t, b), do_relu in zip(params, relu_after):
        z = z @ w_t + b
        if do_relu:
            z = jnp.maximum(z, 0.0)
    return z


if __name__ == "__main__":
    key = jax.random.PRNGKey(0)
    key, kx = jax.random.split(key)
    # Matches Model.get_input: torch.randn((8, 3))
    x = jax.random.normal(kx, (8, 3), jnp.float32)

    params = init_params(key)
    params_flat = pack_params(params)

    out = mlp_forward(x, params_flat)
    out = jax.block_until_ready(out)

    ref = reference_forward(x, params)
    assert out.shape == (8, 2), out.shape
    assert jnp.allclose(out, ref, atol=1e-5, rtol=1e-5), (out, ref)

    print("KERNEL_OK")
</pallas_src>

<mosaic_0001>
module attributes {stable_mosaic.version = 11 : i64} {
  func.func @mlp_kernel(%arg0: i32, %arg1: memref<60xf32, #tpu.memory_space<smem>>, %arg2: memref<3x128xf32, #tpu.memory_space<vmem>>, %arg3: memref<2x128xf32, #tpu.memory_space<vmem>>) attributes {dimension_semantics = [#tpu.dimension_semantics<parallel>], iteration_bounds = array<i64: 1>, scalar_prefetch = 0 : i64, scratch_operands = 0 : i64, tpu.core_type = #tpu.core_type<tc>, window_params = [{transform_indices = @transform_0, window_bounds = array<i64: 60>}, {transform_indices = @transform_1, window_bounds = array<i64: 3, 128>}, {transform_indices = @transform_2, window_bounds = array<i64: 2, 128>}]} {
    %c0 = arith.constant 0 : index
    %c0_0 = arith.constant 0 : index
    %0 = vector.load %arg2[%c0, %c0_0] : memref<3x128xf32, #tpu.memory_space<vmem>>, vector<1x128xf32>
    %c1 = arith.constant 1 : index
    %c0_1 = arith.constant 0 : index
    %1 = vector.load %arg2[%c1, %c0_1] : memref<3x128xf32, #tpu.memory_space<vmem>>, vector<1x128xf32>
    %c2 = arith.constant 2 : index
    %c0_2 = arith.constant 0 : index
    %2 = vector.load %arg2[%c2, %c0_2] : memref<3x128xf32, #tpu.memory_space<vmem>>, vector<1x128xf32>
    %c0_3 = arith.constant 0 : index
    %3 = memref.load %arg1[%c0_3] : memref<60xf32, #tpu.memory_space<smem>>
    %4 = vector.broadcast %3 : f32 to vector<1x128xf32>
    %5 = arith.mulf %4, %0 : vector<1x128xf32>
    %c5 = arith.constant 5 : index
    %6 = memref.load %arg1[%c5] : memref<60xf32, #tpu.memory_space<smem>>
    %7 = vector.broadcast %6 : f32 to vector<1x128xf32>
    %8 = arith.mulf %7, %1 : vector<1x128xf32>
    %9 = arith.addf %5, %8 : vector<1x128xf32>
    %c10 = arith.constant 10 : index
    %10 = memref.load %arg1[%c10] : memref<60xf32, #tpu.memory_space<smem>>
    %11 = vector.broadcast %10 : f32 to vector<1x128xf32>
    %12 = arith.mulf %11, %2 : vector<1x128xf32>
    %13 = arith.addf %9, %12 : vector<1x128xf32>
    %c15 = arith.constant 15 : index
    %14 = memref.load %arg1[%c15] : memref<60xf32, #tpu.memory_space<smem>>
    %15 = vector.broadcast %14 : f32 to vector<1x128xf32>
    %16 = arith.addf %13, %15 : vector<1x128xf32>
    %cst = arith.constant 0.000000e+00 : f32
    %17 = vector.broadcast %cst : f32 to vector<1x128xf32>
    %18 = arith.maximumf %16, %17 : vector<1x128xf32>
    %c1_4 = arith.constant 1 : index
    %19 = memref.load %arg1[%c1_4] : memref<60xf32, #tpu.memory_space<smem>>
    %20 = vector.broadcast %19 : f32 to vector<1x128xf32>
    %21 = arith.mulf %20, %0 : vector<1x128xf32>
    %c6 = arith.constant 6 : index
    %22 = memref.load %arg1[%c6] : memref<60xf32, #tpu.memory_space<smem>>
    %23 = vector.broadcast %22 : f32 to vector<1x128xf32>
    %24 = arith.mulf %23, %1 : vector<1x128xf32>
    %25 = arith.addf %21, %24 : vector<1x128xf32>
    %c11 = arith.constant 11 : index
    %26 = memref.load %arg1[%c11] : memref<60xf32, #tpu.memory_space<smem>>
    %27 = vector.broadcast %26 : f32 to vector<1x128xf32>
    %28 = arith.mulf %27, %2 : vector<1x128xf32>
    %29 = arith.addf %25, %28 : vector<1x128xf32>
    %c16 = arith.constant 16 : index
    %30 = memref.load %arg1[%c16] : memref<60xf32, #tpu.memory_space<smem>>
    %31 = vector.broadcast %30 : f32 to vector<1x128xf32>
    %32 = arith.addf %29, %31 : vector<1x128xf32>
    %cst_5 = arith.constant 0.000000e+00 : f32
    %33 = vector.broadcast %cst_5 : f32 to vector<1x128xf32>
    %34 = arith.maximumf %32, %33 : vector<1x128xf32>
    %c2_6 = arith.constant 2 : index
    %35 = memref.load %arg1[%c2_6] : memref<60xf32, #tpu.memory_space<smem>>
    %36 = vector.broadcast %35 : f32 to vector<1x128xf32>
    %37 = arith.mulf %36, %0 : vector<1x128xf32>
    %c7 = arith.constant 7 : index
    %38 = memref.load %arg1[%c7] : memref<60xf32, #tpu.memory_space<smem>>
    %39 = vector.broadcast %38 : f32 to vector<1x128xf32>
    %40 = arith.mulf %39, %1 : vector<1x128xf32>
    %41 = arith.addf %37, %40 : vector<1x128xf32>
    %c12 = arith.constant 12 : index
    %42 = memref.load %arg1[%c12] : memref<60xf32, #tpu.memory_space<smem>>
    %43 = vector.broadcast %42 : f32 to vector<1x128xf32>
    %44 = arith.mulf %43, %2 : vector<1x128xf32>
    %45 = arith.addf %41, %44 : vector<1x128xf32>
    %c17 = arith.constant 17 : index
    %46 = memref.load %arg1[%c17] : memref<60xf32, #tpu.memory_space<smem>>
    %47 = vector.broadcast %46 : f32 to vector<1x128xf32>
    %48 = arith.addf %45, %47 : vector<1x128xf32>
    %cst_7 = arith.constant 0.000000e+00 : f32
    %49 = vector.broadcast %cst_7 : f32 to vector<1x128xf32>
    %50 = arith.maximumf %48, %49 : vector<1x128xf32>
    %c3 = arith.constant 3 : index
    %51 = memref.load %arg1[%c3] : memref<60xf32, #tpu.memory_space<smem>>
    %52 = vector.broadcast %51 : f32 to vector<1x128xf32>
    %53 = arith.mulf %52, %0 : vector<1x128xf32>
    %c8 = arith.constant 8 : index
    %54 = memref.load %arg1[%c8] : memref<60xf32, #tpu.memory_space<smem>>
    %55 = vector.broadcast %54 : f32 to vector<1x128xf32>
    %56 = arith.mulf %55, %1 : vector<1x128xf32>
    %57 = arith.addf %53, %56 : vector<1x128xf32>
    %c13 = arith.constant 13 : index
    %58 = memref.load %arg1[%c13] : memref<60xf32, #tpu.memory_space<smem>>
    %59 = vector.broadcast %58 : f32 to vector<1x128xf32>
    %60 = arith.mulf %59, %2 : vector<1x128xf32>
    %61 = arith.addf %57, %60 : vector<1x128xf32>
    %c18 = arith.constant 18 : index
    %62 = memref.load %arg1[%c18] : memref<60xf32, #tpu.memory_space<smem>>
    %63 = vector.broadcast %62 : f32 to vector<1x128xf32>
    %64 = arith.addf %61, %63 : vector<1x128xf32>
    %cst_8 = arith.constant 0.000000e+00 : f32
    %65 = vector.broadcast %cst_8 : f32 to vector<1x128xf32>
    %66 = arith.maximumf %64, %65 : vector<1x128xf32>
    %c4 = arith.constant 4 : index
    %67 = memref.load %arg1[%c4] : memref<60xf32, #tpu.memory_space<smem>>
    %68 = vector.broadcast %67 : f32 to vector<1x128xf32>
    %69 = arith.mulf %68, %0 : vector<1x128xf32>
    %c9 = arith.constant 9 : index
    %70 = memref.load %arg1[%c9] : memref<60xf32, #tpu.memory_space<smem>>
    %71 = vector.broadcast %70 : f32 to vector<1x128xf32>
    %72 = arith.mulf %71, %1 : vector<1x128xf32>
    %73 = arith.addf %69, %72 : vector<1x128xf32>
    %c14 = arith.constant 14 : index
    %74 = memref.load %arg1[%c14] : memref<60xf32, #tpu.memory_space<smem>>
    %75 = vector.broadcast %74 : f32 to vector<1x128xf32>
    %76 = arith.mulf %75, %2 : vector<1x128xf32>
    %77 = arith.addf %73, %76 : vector<1x128xf32>
    %c19 = arith.constant 19 : index
    %78 = memref.load %arg1[%c19] : memref<60xf32, #tpu.memory_space<smem>>
    %79 = vector.broadcast %78 : f32 to vector<1x128xf32>
    %80 = arith.addf %77, %79 : vector<1x128xf32>
    %cst_9 = arith.constant 0.000000e+00 : f32
    %81 = vector.broadcast %cst_9 : f32 to vector<1x128xf32>
    %82 = arith.maximumf %80, %81 : vector<1x128xf32>
    %c20 = arith.constant 20 : index
    %83 = memref.load %arg1[%c20] : memref<60xf32, #tpu.memory_space<smem>>
    %84 = vector.broadcast %83 : f32 to vector<1x128xf32>
    %85 = arith.mulf %84, %18 : vector<1x128xf32>
    %c24 = arith.constant 24 : index
    %86 = memref.load %arg1[%c24] : memref<60xf32, #tpu.memory_space<smem>>
    %87 = vector.broadcast %86 : f32 to vector<1x128xf32>
    %88 = arith.mulf %87, %34 : vector<1x128xf32>
    %89 = arith.addf %85, %88 : vector<1x128xf32>
    %c28 = arith.constant 28 : index
    %90 = memref.load %arg1[%c28] : memref<60xf32, #tpu.memory_space<smem>>
    %91 = vector.broadcast %90 : f32 to vector<1x128xf32>
    %92 = arith.mulf %91, %50 : vector<1x128xf32>
    %93 = arith.addf %89, %92 : vector<1x128xf32>
    %c32 = arith.constant 32 : index
    %94 = memref.load %arg1[%c32] : memref<60xf32, #tpu.memory_space<smem>>
    %95 = vector.broadcast %94 : f32 to vector<1x128xf32>
    %96 = arith.mulf %95, %66 : vector<1x128xf32>
    %97 = arith.addf %93, %96 : vector<1x128xf32>
    %c36 = arith.constant 36 : index
    %98 = memref.load %arg1[%c36] : memref<60xf32, #tpu.memory_space<smem>>
    %99 = vector.broadcast %98 : f32 to vector<1x128xf32>
    %100 = arith.mulf %99, %82 : vector<1x128xf32>
    %101 = arith.addf %97, %100 : vector<1x128xf32>
    %c40 = arith.constant 40 : index
    %102 = memref.load %arg1[%c40] : memref<60xf32, #tpu.memory_space<smem>>
    %103 = vector.broadcast %102 : f32 to vector<1x128xf32>
    %104 = arith.addf %101, %103 : vector<1x128xf32>
    %cst_10 = arith.constant 0.000000e+00 : f32
    %105 = vector.broadcast %cst_10 : f32 to vector<1x128xf32>
    %106 = arith.maximumf %104, %105 : vector<1x128xf32>
    %c21 = arith.constant 21 : index
    %107 = memref.load %arg1[%c21] : memref<60xf32, #tpu.memory_space<smem>>
    %108 = vector.broadcast %107 : f32 to vector<1x128xf32>
    %109 = arith.mulf %108, %18 : vector<1x128xf32>
    %c25 = arith.constant 25 : index
    %110 = memref.load %arg1[%c25] : memref<60xf32, #tpu.memory_space<smem>>
    %111 = vector.broadcast %110 : f32 to vector<1x128xf32>
    %112 = arith.mulf %111, %34 : vector<1x128xf32>
    %113 = arith.addf %109, %112 : vector<1x128xf32>
    %c29 = arith.constant 29 : index
    %114 = memref.load %arg1[%c29] : memref<60xf32, #tpu.memory_space<smem>>
    %115 = vector.broadcast %114 : f32 to vector<1x128xf32>
    %116 = arith.mulf %115, %50 : vector<1x128xf32>
    %117 = arith.addf %113, %116 : vector<1x128xf32>
    %c33 = arith.constant 33 : index
    %118 = memref.load %arg1[%c33] : memref<60xf32, #tpu.memory_space<smem>>
    %119 = vector.broadcast %118 : f32 to vector<1x128xf32>
    %120 = arith.mulf %119, %66 : vector<1x128xf32>
    %121 = arith.addf %117, %120 : vector<1x128xf32>
    %c37 = arith.constant 37 : index
    %122 = memref.load %arg1[%c37] : memref<60xf32, #tpu.memory_space<smem>>
    %123 = vector.broadcast %122 : f32 to vector<1x128xf32>
    %124 = arith.mulf %123, %82 : vector<1x128xf32>
    %125 = arith.addf %121, %124 : vector<1x128xf32>
    %c41 = arith.constant 41 : index
    %126 = memref.load %arg1[%c41] : memref<60xf32, #tpu.memory_space<smem>>
    %127 = vector.broadcast %126 : f32 to vector<1x128xf32>
    %128 = arith.addf %125, %127 : vector<1x128xf32>
    %cst_11 = arith.constant 0.000000e+00 : f32
    %129 = vector.broadcast %cst_11 : f32 to vector<1x128xf32>
    %130 = arith.maximumf %128, %129 : vector<1x128xf32>
    %c22 = arith.constant 22 : index
    %131 = memref.load %arg1[%c22] : memref<60xf32, #tpu.memory_space<smem>>
    %132 = vector.broadcast %131 : f32 to vector<1x128xf32>
    %133 = arith.mulf %132, %18 : vector<1x128xf32>
    %c26 = arith.constant 26 : index
    %134 = memref.load %arg1[%c26] : memref<60xf32, #tpu.memory_space<smem>>
    %135 = vector.broadcast %134 : f32 to vector<1x128xf32>
    %136 = arith.mulf %135, %34 : vector<1x128xf32>
    %137 = arith.addf %133, %136 : vector<1x128xf32>
    %c30 = arith.constant 30 : index
    %138 = memref.load %arg1[%c30] : memref<60xf32, #tpu.memory_space<smem>>
    %139 = vector.broadcast %138 : f32 to vector<1x128xf32>
    %140 = arith.mulf %139, %50 : vector<1x128xf32>
    %141 = arith.addf %137, %140 : vector<1x128xf32>
    %c34 = arith.constant 34 : index
    %142 = memref.load %arg1[%c34] : memref<60xf32, #tpu.memory_space<smem>>
    %143 = vector.broadcast %142 : f32 to vector<1x128xf32>
    %144 = arith.mulf %143, %66 : vector<1x128xf32>
    %145 = arith.addf %141, %144 : vector<1x128xf32>
    %c38 = arith.constant 38 : index
    %146 = memref.load %arg1[%c38] : memref<60xf32, #tpu.memory_space<smem>>
    %147 = vector.broadcast %146 : f32 to vector<1x128xf32>
    %148 = arith.mulf %147, %82 : vector<1x128xf32>
    %149 = arith.addf %145, %148 : vector<1x128xf32>
    %c42 = arith.constant 42 : index
    %150 = memref.load %arg1[%c42] : memref<60xf32, #tpu.memory_space<smem>>
    %151 = vector.broadcast %150 : f32 to vector<1x128xf32>
    %152 = arith.addf %149, %151 : vector<1x128xf32>
    %cst_12 = arith.constant 0.000000e+00 : f32
    %153 = vector.broadcast %cst_12 : f32 to vector<1x128xf32>
    %154 = arith.maximumf %152, %153 : vector<1x128xf32>
    %c23 = arith.constant 23 : index
    %155 = memref.load %arg1[%c23] : memref<60xf32, #tpu.memory_space<smem>>
    %156 = vector.broadcast %155 : f32 to vector<1x128xf32>
    %157 = arith.mulf %156, %18 : vector<1x128xf32>
    %c27 = arith.constant 27 : index
    %158 = memref.load %arg1[%c27] : memref<60xf32, #tpu.memory_space<smem>>
    %159 = vector.broadcast %158 : f32 to vector<1x128xf32>
    %160 = arith.mulf %159, %34 : vector<1x128xf32>
    %161 = arith.addf %157, %160 : vector<1x128xf32>
    %c31 = arith.constant 31 : index
    %162 = memref.load %arg1[%c31] : memref<60xf32, #tpu.memory_space<smem>>
    %163 = vector.broadcast %162 : f32 to vector<1x128xf32>
    %164 = arith.mulf %163, %50 : vector<1x128xf32>
    %165 = arith.addf %161, %164 : vector<1x128xf32>
    %c35 = arith.constant 35 : index
    %166 = memref.load %arg1[%c35] : memref<60xf32, #tpu.memory_space<smem>>
    %167 = vector.broadcast %166 : f32 to vector<1x128xf32>
    %168 = arith.mulf %167, %66 : vector<1x128xf32>
    %169 = arith.addf %165, %168 : vector<1x128xf32>
    %c39 = arith.constant 39 : index
    %170 = memref.load %arg1[%c39] : memref<60xf32, #tpu.memory_space<smem>>
    %171 = vector.broadcast %170 : f32 to vector<1x128xf32>
    %172 = arith.mulf %171, %82 : vector<1x128xf32>
    %173 = arith.addf %169, %172 : vector<1x128xf32>
    %c43 = arith.constant 43 : index
    %174 = memref.load %arg1[%c43] : memref<60xf32, #tpu.memory_space<smem>>
    %175 = vector.broadcast %174 : f32 to vector<1x128xf32>
    %176 = arith.addf %173, %175 : vector<1x128xf32>
    %cst_13 = arith.constant 0.000000e+00 : f32
    %177 = vector.broadcast %cst_13 : f32 to vector<1x128xf32>
    %178 = arith.maximumf %176, %177 : vector<1x128xf32>
    %c44 = arith.constant 44 : index
    %179 = memref.load %arg1[%c44] : memref<60xf32, #tpu.memory_space<smem>>
    %180 = vector.broadcast %179 : f32 to vector<1x128xf32>
    %181 = arith.mulf %180, %106 : vector<1x128xf32>
    %c46 = arith.constant 46 : index
    %182 = memref.load %arg1[%c46] : memref<60xf32, #tpu.memory_space<smem>>
    %183 = vector.broadcast %182 : f32 to vector<1x128xf32>
    %184 = arith.mulf %183, %130 : vector<1x128xf32>
    %185 = arith.addf %181, %184 : vector<1x128xf32>
    %c48 = arith.constant 48 : index
    %186 = memref.load %arg1[%c48] : memref<60xf32, #tpu.memory_space<smem>>
    %187 = vector.broadcast %186 : f32 to vector<1x128xf32>
    %188 = arith.mulf %187, %154 : vector<1x128xf32>
    %189 = arith.addf %185, %188 : vector<1x128xf32>
    %c50 = arith.constant 50 : index
    %190 = memref.load %arg1[%c50] : memref<60xf32, #tpu.memory_space<smem>>
    %191 = vector.broadcast %190 : f32 to vector<1x128xf32>
    %192 = arith.mulf %191, %178 : vector<1x128xf32>
    %193 = arith.addf %189, %192 : vector<1x128xf32>
    %c52 = arith.constant 52 : index
    %194 = memref.load %arg1[%c52] : memref<60xf32, #tpu.memory_space<smem>>
    %195 = vector.broadcast %194 : f32 to vector<1x128xf32>
    %196 = arith.addf %193, %195 : vector<1x128xf32>
    %cst_14 = arith.constant 0.000000e+00 : f32
    %197 = vector.broadcast %cst_14 : f32 to vector<1x128xf32>
    %198 = arith.maximumf %196, %197 : vector<1x128xf32>
    %c45 = arith.constant 45 : index
    %199 = memref.load %arg1[%c45] : memref<60xf32, #tpu.memory_space<smem>>
    %200 = vector.broadcast %199 : f32 to vector<1x128xf32>
    %201 = arith.mulf %200, %106 : vector<1x128xf32>
    %c47 = arith.constant 47 : index
    %202 = memref.load %arg1[%c47] : memref<60xf32, #tpu.memory_space<smem>>
    %203 = vector.broadcast %202 : f32 to vector<1x128xf32>
    %204 = arith.mulf %203, %130 : vector<1x128xf32>
    %205 = arith.addf %201, %204 : vector<1x128xf32>
    %c49 = arith.constant 49 : index
    %206 = memref.load %arg1[%c49] : memref<60xf32, #tpu.memory_space<smem>>
    %207 = vector.broadcast %206 : f32 to vector<1x128xf32>
    %208 = arith.mulf %207, %154 : vector<1x128xf32>
    %209 = arith.addf %205, %208 : vector<1x128xf32>
    %c51 = arith.constant 51 : index
    %210 = memref.load %arg1[%c51] : memref<60xf32, #tpu.memory_space<smem>>
    %211 = vector.broadcast %210 : f32 to vector<1x128xf32>
    %212 = arith.mulf %211, %178 : vector<1x128xf32>
    %213 = arith.addf %209, %212 : vector<1x128xf32>
    %c53 = arith.constant 53 : index
    %214 = memref.load %arg1[%c53] : memref<60xf32, #tpu.memory_space<smem>>
    %215 = vector.broadcast %214 : f32 to vector<1x128xf32>
    %216 = arith.addf %213, %215 : vector<1x128xf32>
    %cst_15 = arith.constant 0.000000e+00 : f32
    %217 = vector.broadcast %cst_15 : f32 to vector<1x128xf32>
    %218 = arith.maximumf %216, %217 : vector<1x128xf32>
    %c54 = arith.constant 54 : index
    %219 = memref.load %arg1[%c54] : memref<60xf32, #tpu.memory_space<smem>>
    %220 = vector.broadcast %219 : f32 to vector<1x128xf32>
    %221 = arith.mulf %220, %198 : vector<1x128xf32>
    %c56 = arith.constant 56 : index
    %222 = memref.load %arg1[%c56] : memref<60xf32, #tpu.memory_space<smem>>
    %223 = vector.broadcast %222 : f32 to vector<1x128xf32>
    %224 = arith.mulf %223, %218 : vector<1x128xf32>
    %225 = arith.addf %221, %224 : vector<1x128xf32>
    %c58 = arith.constant 58 : index
    %226 = memref.load %arg1[%c58] : memref<60xf32, #tpu.memory_space<smem>>
    %227 = vector.broadcast %226 : f32 to vector<1x128xf32>
    %228 = arith.addf %225, %227 : vector<1x128xf32>
    %cst_16 = arith.constant 0.000000e+00 : f32
    %229 = vector.broadcast %cst_16 : f32 to vector<1x128xf32>
    %230 = arith.maximumf %228, %229 : vector<1x128xf32>
    %c55 = arith.constant 55 : index
    %231 = memref.load %arg1[%c55] : memref<60xf32, #tpu.memory_space<smem>>
    %232 = vector.broadcast %231 : f32 to vector<1x128xf32>
    %233 = arith.mulf %232, %198 : vector<1x128xf32>
    %c57 = arith.constant 57 : index
    %234 = memref.load %arg1[%c57] : memref<60xf32, #tpu.memory_space<smem>>
    %235 = vector.broadcast %234 : f32 to vector<1x128xf32>
    %236 = arith.mulf %235, %218 : vector<1x128xf32>
    %237 = arith.addf %233, %236 : vector<1x128xf32>
    %c59 = arith.constant 59 : index
    %238 = memref.load %arg1[%c59] : memref<60xf32, #tpu.memory_space<smem>>
    %239 = vector.broadcast %238 : f32 to vector<1x128xf32>
    %240 = arith.addf %237, %239 : vector<1x128xf32>
    %cst_17 = arith.constant 0.000000e+00 : f32
    %241 = vector.broadcast %cst_17 : f32 to vector<1x128xf32>
    %242 = arith.maximumf %240, %241 : vector<1x128xf32>
    %243 = tpu.concatenate %230, %242 in 0 : vector<1x128xf32>, vector<1x128xf32> -> vector<2x128xf32>
    %c0_18 = arith.constant 0 : index
    %c0_19 = arith.constant 0 : index
    %244 = vector.load %arg3[%c0_18, %c0_19] : memref<2x128xf32, #tpu.memory_space<vmem>>, vector<2x128xf32>
    tpu.vector_store %arg3[%c0_18, %c0_19], %243 {strides = array<i32>} : memref<2x128xf32, #tpu.memory_space<vmem>>, vector<2x128xf32>,
    return
  }
  func.func @transform_0(%arg0: i32) -> i32 {
    %c0_i32 = arith.constant 0 : i32
    %c0_i32_0 = arith.constant 0 : i32
    return %c0_i32 : i32
  }
  func.func @transform_1(%arg0: i32) -> (i32, i32) {
    %c0_i32 = arith.constant 0 : i32
    %c0_i32_0 = arith.constant 0 : i32
    return %c0_i32, %arg0 : i32, i32
  }
  func.func @transform_2(%arg0: i32) -> (i32, i32) {
    %c0_i32 = arith.constant 0 : i32
    %c0_i32_0 = arith.constant 0 : i32
    return %c0_i32, %arg0 : i32, i32
  }
}

</mosaic_0001>

<bundles_post_ra>
// kernel: tpu_custom_call.1
= control target key start
LH: loop header
LB: loop body
LE: loop exit
PB: predicated region body
PF: predicated region fallthrough
CT: control target
= control target key end

     0   :  { %7 = vsyncpa [#allocation5], 0  ;;  %s521_s0 = inlined_call_operand.hbm [shape: f32[60], index: 0, kind: input, shape index: {}]   ;;  %s522_s1 = inlined_call_operand.hbm [shape: f32[3,128], index: 1, kind: input, shape index: {}]   ;;  %s523_s2 = inlined_call_operand.hbm [shape: f32[2,128], index: 2, kind: output, shape index: {}]  }
   0x1   :  { %8 = vsyncpa [#allocation3], 0 }
   0x2   :  { %9 = vsyncpa [#allocation4], 0  ;;  %s15_s11 = sshll.u32 %s521_s0, 4  ;;  %s24_s14 = sshll.u32 %s522_s1, 4  ;;  %s16_s11 = int_to_ptr.hbm [resolvable:$true] %s15_s11  ;;  %s25_s14 = int_to_ptr.hbm [resolvable:$true] %s24_s14 }
   0x3   :  { %s421_s15 = smov [#allocation2]   ;;  %s422_s16 = smov [#allocation6]  }
   0x4   :  { %18 = dma.hbm_to_smem %s16_s11, 16, %s421_s15, [#allocation5]  }
   0x5   :  { %s26_s17 = sshll.u32 %s422_s16, 4  ;;  %s27_s17 = int_to_ptr.vmem [resolvable:$true] %s26_s17 }
   0x6   :  { %29 = dma.hbm_to_vmem [thread:$0]  %s25_s14, 64, %s27_s17, [#allocation3]  }
   0x7   :  { %415 = dma.done.wait [#allocation5], 16  }
   0x8   :  { %416 = vsyncadd [#allocation5], 4294967280 }
   0x9   :  { %417 = dma.done.wait [#allocation3], 64  }
   0xa   :  { %418 = vsyncadd [#allocation3], 4294967232 }
   0xb   :  { %38 = sfence }
   0xc   :  { %s42_s18 = sld [smem:[#allocation2]]  ;;  %v39_v0 = vld [vmem:[#allocation6] sm:$0x1]  ;;  %v447_v1 = vld [vmem:[#allocation6 + $0x1] sm:$0x1]  ;;  %vm272_vm0 = vcmask 1040384  }
   0xd   :  { %s293_s19 = sld [smem:[#allocation2 + $0x5]]  ;;  %v41_v5 = vld [vmem:[#allocation6 + $0x2] sm:$0x1] }
   0xe   :  { %s294_s0 = sld [smem:[#allocation2 + $0xa]] }
   0xf   :  { %s445_s20 = sld [smem:[#allocation2 + $0xf]] }
  0x10   :  { %s296_s21 = sld [smem:[#allocation2 + $0x1]] }
  0x11   :  { %s297_s1 = sld [smem:[#allocation2 + $0x6]] }
  0x12   :  { %v43_v2 = vstv %s42_s18  ;;  %s298_s22 = sld [smem:[#allocation2 + $0xb]] }
  0x13   :  { %v44_v3 = vmul.f32 %v43_v2, %v39_v0  ;;  %v46_v4 = vstv %s293_s19  ;;  %s449_s23 = sld [smem:[#allocation2 + $0x10]] }
  0x14   :  { %v47_v6 = vmul.f32 %v46_v4, %v447_v1  ;;  %v50_v7 = vstv %s294_s0  ;;  %s300_s24 = sld [smem:[#allocation2 + $0x2]] }
  0x15   :  { %s301_s25 = sld [smem:[#allocation2 + $0x7]]  ;;  %v51_v10 = vmul.f32 %v50_v7, %v41_v5  ;;  %v54_v21 = vstv %s445_s20 }
  0x16   :  { %v58_v8 = vstv %s296_s21  ;;  %s302_s26 = sld [smem:[#allocation2 + $0xc]]  ;;  %v48_v9 = vadd.f32 %v47_v6, %v44_v3 }
  0x17   :  { %v59_v11 = vmul.f32 %v58_v8, %v39_v0  ;;  %v61_v12 = vstv %s297_s1  ;;  %s452_s27 = sld [smem:[#allocation2 + $0x11]] }
  0x18   :  { %v62_v13 = vmul.f32 %v61_v12, %v447_v1  ;;  %v65_v14 = vstv %s298_s22  ;;  %s304_s28 = sld [smem:[#allocation2 + $0x3]]  ;;  %v52_v18 = vadd.f32 %v51_v10, %v48_v9 }
  0x19   :  { %v66_v15 = vmul.f32 %v65_v14, %v41_v5  ;;  %s305_s29 = sld [smem:[#allocation2 + $0x8]]  ;;  %v69_v25 = vstv %s449_s23 }
  0x1a   :  { %v63_v16 = vadd.f32 %v62_v13, %v59_v11  ;;  %v73_v17 = vstv %s300_s24  ;;  %s306_s30 = sld [smem:[#allocation2 + $0xd]]  ;;  %v55_v29 = vadd.f32 %v54_v21, %v52_v18 }
  0x1b   :  { %v74_v19 = vmul.f32 %v73_v17, %v39_v0  ;;  %v76_v20 = vstv %s301_s25  ;;  %s455_s3 = sld [smem:[#allocation2 + $0x12]] }
  0x1c   :  { %v67_v22 = vadd.f32 %v66_v15, %v63_v16  ;;  %v77_v23 = vmul.f32 %v76_v20, %v447_v1  ;;  %v80_v24 = vstv %s302_s26  ;;  %s308_s4 = sld [smem:[#allocation2 + $0x4]]  ;;  %v464_v41 = vmax.f32 %v55_v29, 0.0 }
  0x1d   :  { %v81_v26 = vmul.f32 %v80_v24, %v41_v5  ;;  %s309_s5 = sld [smem:[#allocation2 + $0x9]]  ;;  %v84_v30 = vstv %s452_s27 }
  0x1e   :  { %v78_v27 = vadd.f32 %v77_v23, %v74_v19  ;;  %v88_v28 = vstv %s304_s28  ;;  %s310_s6 = sld [smem:[#allocation2 + $0xe]]  ;;  %v70_v33 = vadd.f32 %v69_v25, %v67_v22 }
  0x1f   :  { %v89_v31 = vmul.f32 %v88_v28, %v39_v0  ;;  %v91_v32 = vstv %s305_s29  ;;  %s461_s7 = sld [smem:[#allocation2 + $0x13]] }
  0x20   :  { %v82_v34 = vadd.f32 %v81_v26, %v78_v27  ;;  %v92_v35 = vmul.f32 %v91_v32, %v447_v1  ;;  %v95_v36 = vstv %s306_s30  ;;  %s312_s8 = sld [smem:[#allocation2 + $0x14]]  ;;  %v467_v45 = vmax.f32 %v70_v33, 0.0 }
  0x21   :  { %v96_v37 = vmul.f32 %v95_v36, %v41_v5  ;;  %s313_s9 = sld [smem:[#allocation2 + $0x18]]  ;;  %v99_v42 = vstv %s455_s3 }
  0x22   :  { %v85_v38 = vadd.f32 %v84_v30, %v82_v34  ;;  %v93_v39 = vadd.f32 %v92_v35, %v89_v31  ;;  %v103_v40 = vstv %s308_s4  ;;  %s314_s10 = sld [smem:[#allocation2 + $0x1c]] }
  0x23   :  { %v104_v43 = vmul.f32 %v103_v40, %v39_v0  ;;  %v106_v44 = vstv %s309_s5  ;;  %s315_s11 = sld [smem:[#allocation2 + $0x20]] }
  0x24   :  { %v97_v46 = vadd.f32 %v96_v37, %v93_v39  ;;  %v107_v47 = vmul.f32 %v106_v44, %v447_v1  ;;  %v110_v48 = vstv %s310_s6  ;;  %s470_s12 = sld [smem:[#allocation2 + $0x24]]  ;;  %v472_v49 = vmax.f32 %v85_v38, 0.0 }
  0x25   :  { %v111_v50 = vmul.f32 %v110_v48, %v41_v5  ;;  %s474_s13 = sld [smem:[#allocation2 + $0x28]]  ;;  %v114_v54 = vstv %s461_s7 }
  0x26   :  { %v100_v51 = vadd.f32 %v99_v42, %v97_v46  ;;  %v108_v52 = vadd.f32 %v107_v47, %v104_v43  ;;  %v118_v53 = vstv %s312_s8  ;;  %s318_s14 = sld [smem:[#allocation2 + $0x15]] }
  0x27   :  { %v119_v55 = vmul.f32 %v118_v53, %v464_v41  ;;  %v121_v56 = vstv %s313_s9  ;;  %s319_s15 = sld [smem:[#allocation2 + $0x19]] }
  0x28   :  { %v478_v57 = vmax.f32 %v100_v51, 0.0  ;;  %v112_v58 = vadd.f32 %v111_v50, %v108_v52  ;;  %v122_v59 = vmul.f32 %v121_v56, %v467_v45  ;;  %v125_v60 = vstv %s314_s10  ;;  %s320_s16 = sld [smem:[#allocation2 + $0x1d]] }
  0x29   :  { %v126_v61 = vmul.f32 %v125_v60, %v472_v49  ;;  %v129_v62 = vstv %s315_s11  ;;  %s321_s17 = sld [smem:[#allocation2 + $0x21]] }
  0x2a   :  { %v115_v63 = vadd.f32 %v114_v54, %v112_v58  ;;  %v123_v0 = vadd.f32 %v122_v59, %v119_v55  ;;  %v130_v1 = vmul.f32 %v129_v62, %v478_v57  ;;  %s322_s18 = sld [smem:[#allocation2 + $0x25]]  ;;  %v133_v2 = vstv %s470_s12 }
  0x2b   :  { %s484_s19 = sld [smem:[#allocation2 + $0x29]]  ;;  %v137_v18 = vstv %s474_s13 }
  0x2c   :  { %v486_v3 = vmax.f32 %v115_v63, 0.0  ;;  %v127_v4 = vadd.f32 %v126_v61, %v123_v0  ;;  %v141_v5 = vstv %s318_s14  ;;  %s324_s0 = sld [smem:[#allocation2 + $0x16]] }
  0x2d   :  { %v142_v6 = vmul.f32 %v141_v5, %v464_v41  ;;  %v144_v7 = vstv %s319_s15  ;;  %s325_s20 = sld [smem:[#allocation2 + $0x1a]] }
  0x2e   :  { %v131_v8 = vadd.f32 %v130_v1, %v127_v4  ;;  %v134_v9 = vmul.f32 %v133_v2, %v486_v3  ;;  %v145_v10 = vmul.f32 %v144_v7, %v467_v45  ;;  %v148_v11 = vstv %s320_s16  ;;  %s326_s21 = sld [smem:[#allocation2 + $0x1e]] }
  0x2f   :  { %v149_v12 = vmul.f32 %v148_v11, %v472_v49  ;;  %v152_v13 = vstv %s321_s17  ;;  %s327_s1 = sld [smem:[#allocation2 + $0x22]] }
  0x30   :  { %v146_v14 = vadd.f32 %v145_v10, %v142_v6  ;;  %v153_v15 = vmul.f32 %v152_v13, %v478_v57  ;;  %v156_v16 = vstv %s322_s18  ;;  %s328_s22 = sld [smem:[#allocation2 + $0x26]]  ;;  %v135_v17 = vadd.f32 %v134_v9, %v131_v8  ;;  %s423_s18 = smov [#allocation7]  }
  0x31   :  { %s493_s23 = sld [smem:[#allocation2 + $0x2a]]  ;;  %v157_v20 = vmul.f32 %v156_v16, %v486_v3  ;;  %v160_v28 = vstv %s484_s19  ;;  %s280_s19 = sshll.u32 %s423_s18, 4  ;;  %s281_s19 = int_to_ptr.vmem [resolvable:$true] %s280_s19 }
  0x32   :  { %v150_v19 = vadd.f32 %v149_v12, %v146_v14  ;;  %v164_v21 = vstv %s324_s0  ;;  %s330_s24 = sld [smem:[#allocation2 + $0x17]]  ;;  %v138_v27 = vadd.f32 %v137_v18, %v135_v17 }
  0x33   :  { %v165_v22 = vmul.f32 %v164_v21, %v464_v41  ;;  %v167_v23 = vstv %s325_s20  ;;  %s331_s25 = sld [smem:[#allocation2 + $0x1b]] }
  0x34   :  { %v154_v24 = vadd.f32 %v153_v15, %v150_v19  ;;  %v168_v25 = vmul.f32 %v167_v23, %v467_v45  ;;  %v171_v26 = vstv %s326_s21  ;;  %s332_s26 = sld [smem:[#allocation2 + $0x1f]]  ;;  %v139_v42 = vmax.f32 %v138_v27, 0.0  ;;  %s282_s21 = sshll.u32 %s523_s2, 4  ;;  %s283_s21 = int_to_ptr.hbm [resolvable:$true] %s282_s21 }
  0x35   :  { %v172_v29 = vmul.f32 %v171_v26, %v472_v49  ;;  %v175_v30 = vstv %s327_s1  ;;  %s333_s27 = sld [smem:[#allocation2 + $0x23]] }
  0x36   :  { %v158_v31 = vadd.f32 %v157_v20, %v154_v24  ;;  %v169_v32 = vadd.f32 %v168_v25, %v165_v22  ;;  %v176_v33 = vmul.f32 %v175_v30, %v478_v57  ;;  %v179_v34 = vstv %s328_s22  ;;  %s334_s28 = sld [smem:[#allocation2 + $0x27]] }
  0x37   :  { %s502_s29 = sld [smem:[#allocation2 + $0x2b]]  ;;  %v180_v37 = vmul.f32 %v179_v34, %v486_v3  ;;  %v183_v48 = vstv %s493_s23 }
  0x38   :  { %v161_v35 = vadd.f32 %v160_v28, %v158_v31  ;;  %v173_v36 = vadd.f32 %v172_v29, %v169_v32  ;;  %v187_v38 = vstv %s330_s24  ;;  %s336_s30 = sld [smem:[#allocation2 + $0x2c]] }
  0x39   :  { %v188_v39 = vmul.f32 %v187_v38, %v464_v41  ;;  %v190_v40 = vstv %s331_s25  ;;  %s337_s3 = sld [smem:[#allocation2 + $0x2e]] }
  0x3a   :  { %v177_v43 = vadd.f32 %v176_v33, %v173_v36  ;;  %v191_v44 = vmul.f32 %v190_v40, %v467_v45  ;;  %v194_v46 = vstv %s332_s26  ;;  %s338_s4 = sld [smem:[#allocation2 + $0x30]]  ;;  %v162_v47 = vmax.f32 %v161_v35, 0.0 }
  0x3b   :  { %v195_v50 = vmul.f32 %v194_v46, %v472_v49  ;;  %v198_v51 = vstv %s333_s27  ;;  %s510_s5 = sld [smem:[#allocation2 + $0x32]] }
  0x3c   :  { %v181_v52 = vadd.f32 %v180_v37, %v177_v43  ;;  %v192_v53 = vadd.f32 %v191_v44, %v188_v39  ;;  %v199_v54 = vmul.f32 %v198_v51, %v478_v57  ;;  %v202_v55 = vstv %s334_s28  ;;  %s341_s6 = sld [smem:[#allocation2 + $0x2d]] }
  0x3d   :  { %v203_v45 = vmul.f32 %v202_v55, %v486_v3  ;;  %s342_s7 = sld [smem:[#allocation2 + $0x2f]]  ;;  %v206_v57 = vstv %s502_s29 }
  0x3e   :  { %v184_v41 = vadd.f32 %v183_v48, %v181_v52  ;;  %v196_v56 = vadd.f32 %v195_v50, %v192_v53  ;;  %v210_v58 = vstv %s336_s30  ;;  %s343_s8 = sld [smem:[#allocation2 + $0x31]] }
  0x3f   :  { %v211_v59 = vmul.f32 %v210_v58, %v139_v42  ;;  %v213_v60 = vstv %s337_s3  ;;  %s344_s9 = sld [smem:[#allocation2 + $0x33]] }
  0x40   :  { %v185_v49 = vmax.f32 %v184_v41, 0.0  ;;  %v200_v61 = vadd.f32 %v199_v54, %v196_v56  ;;  %v214_v62 = vmul.f32 %v213_v60, %v162_v47  ;;  %v217_v63 = vstv %s338_s4  ;;  %s340_s10 = sld [smem:[#allocation2 + $0x34]] }
  0x41   :  { %s345_s11 = sld [smem:[#allocation2 + $0x35]]  ;;  %v221_v7 = vstv %s510_s5 }
  0x42   :  { %v204_v0 = vadd.f32 %v203_v45, %v200_v61  ;;  %v215_v1 = vadd.f32 %v214_v62, %v211_v59  ;;  %v218_v2 = vmul.f32 %v217_v63, %v185_v49  ;;  %v229_v4 = vstv %s341_s6  ;;  %s514_s12 = sld [smem:[#allocation2 + $0x36]] }
  0x43   :  { %v230_v5 = vmul.f32 %v229_v4, %v139_v42  ;;  %v232_v6 = vstv %s342_s7  ;;  %s347_s13 = sld [smem:[#allocation2 + $0x38]] }
  0x44   :  { %v207_v3 = vadd.f32 %v206_v57, %v204_v0  ;;  %v233_v8 = vmul.f32 %v232_v6, %v162_v47  ;;  %v236_v9 = vstv %s343_s8  ;;  %s349_s14 = sld [smem:[#allocation2 + $0x37]]  ;;  %v219_v11 = vadd.f32 %v218_v2, %v215_v1 }
  0x45   :  { %v237_v12 = vmul.f32 %v236_v9, %v185_v49  ;;  %v240_v13 = vstv %s344_s9  ;;  %s350_s15 = sld [smem:[#allocation2 + $0x39]] }
  0x46   :  { %v208_v10 = vmax.f32 %v207_v3, 0.0  ;;  %v234_v14 = vadd.f32 %v233_v8, %v230_v5  ;;  %v225_v17 = vstv %s340_s10  ;;  %s348_s16 = sld [smem:[#allocation2 + $0x3a]] }
  0x47   :  { %v244_v20 = vstv %s345_s11  ;;  %s351_s17 = sld [smem:[#allocation2 + $0x3b]] }
  0x48   :  { %v222_v15 = vmul.f32 %v221_v7, %v208_v10  ;;  %v241_v16 = vmul.f32 %v240_v13, %v208_v10  ;;  %v238_v18 = vadd.f32 %v237_v12, %v234_v14  ;;  %v248_v24 = vstv %s514_s12 }
  0x49   :  { %v251_v27 = vstv %s347_s13 }
  0x4a   :  { %v223_v19 = vadd.f32 %v222_v15, %v219_v11  ;;  %v242_v21 = vadd.f32 %v241_v16, %v238_v18  ;;  %v259_v25 = vstv %s349_s14 }
  0x4b   :  { %v262_v28 = vstv %s350_s15 }
  0x4c   :  { %v226_v22 = vadd.f32 %v225_v17, %v223_v19  ;;  %v245_v23 = vadd.f32 %v244_v20, %v242_v21  ;;  %v255_v34 = vstv %s348_s16 }
  0x4d   :  { %v266_v35 = vstv %s351_s17 }
  0x4e   :  { %v227_v26 = vmax.f32 %v226_v22, 0.0  ;;  %v246_v29 = vmax.f32 %v245_v23, 0.0 }
  0x50   :  { %v249_v30 = vmul.f32 %v248_v24, %v227_v26  ;;  %v260_v31 = vmul.f32 %v259_v25, %v227_v26  ;;  %v252_v32 = vmul.f32 %v251_v27, %v246_v29  ;;  %v263_v33 = vmul.f32 %v262_v28, %v246_v29 }
  0x52   :  { %v253_v36 = vadd.f32 %v252_v32, %v249_v30  ;;  %v264_v37 = vadd.f32 %v263_v33, %v260_v31 }
  0x54   :  { %v256_v38 = vadd.f32 %v255_v34, %v253_v36  ;;  %v267_v39 = vadd.f32 %v266_v35, %v264_v37 }
  0x56   :  { %v257_v40 = vmax.f32 %v256_v38, 0.0  ;;  %v268_v42 = vmax.f32 %v267_v39, 0.0 }
  0x58   :  { %v270_v43 = vrot.slane %v268_v42, 7 }
  0x5a   :  { %v273_v44 = vsel %vm272_vm0, %v257_v40, %v270_v43 }
  0x5b   :  { %274 = vst [vmem:[#allocation7] sm:$0x3] %v273_v44 }
  0x5c   :  { %285 = dma.vmem_to_hbm [thread:$0]  %s281_s19, 32, %s283_s21, [#allocation4]  }
  0x5d   :  { %419 = dma.done.wait [#allocation4], 32  }
  0x5e   :  { %420 = vsyncadd [#allocation4], 4294967264 }
  0x5f   :  { %290 = vsyncpa [#allocation3], 1 }
  0x60   :  { %291 = vsyncpa [#allocation4], 1 }
  0x61   :  { %292 = vsyncpa [#allocation5], 1 }

</bundles_post_ra>
